<compile_context>
chip_gen: v7x
topology: tpu7x:2x2x1
jax: 0.10.0
libtpu: 0.0.40
codegen_flags: <defaults>
</compile_context>

<pallas_src>
import functools

import jax
import jax.numpy as jnp
from jax import lax
from jax.experimental import pallas as pl
from jax.experimental.pallas import tpu as pltpu

_NEG = -1e30          # finite "-inf" for padded keys (keeps softmax NaN-free)
_VMEM_LIMIT = 64 * 1024 * 1024


def _round_up(n, m):
    return -(-n // m) * m


def _pick_head_group(num_heads, head_dim):
    """Smallest head-group size g (dividing H) whose width g*hd is lane-dense
    (multiple of 128).  Fallback: all heads (width == d_model == full dim)."""
    for g in range(1, num_heads + 1):
        if num_heads % g == 0 and (g * head_dim) % 128 == 0:
            return g
    return num_heads


# ---------------------------------------------------------------------------
# Kernel 1a: dense projection  y[b] = x[b] @ W + b   (weight resident in VMEM)
# ---------------------------------------------------------------------------
def _dense_proj_kernel(x_ref, w_ref, b_ref, y_ref):
    y = jnp.dot(x_ref[0], w_ref[...], preferred_element_type=jnp.float32)
    y_ref[0] = (y + b_ref[...]).astype(y_ref.dtype)


def _dense_proj(x, w, b, *, seq_tile):
    B, S, D = x.shape
    d_out = w.shape[1]
    # TODO(synk): tile d_out for very large d_model where D*d_out*4 > VMEM.
    return pl.pallas_call(
        _dense_proj_kernel,
        out_shape=jax.ShapeDtypeStruct((B, S, d_out), x.dtype),
        grid_spec=pltpu.PrefetchScalarGridSpec(
            num_scalar_prefetch=0,
            grid=(B, S // seq_tile),
            in_specs=[
                pl.BlockSpec((1, seq_tile, D), lambda bi, si: (bi, si, 0)),
                pl.BlockSpec((D, d_out), lambda bi, si: (0, 0)),   # resident
                pl.BlockSpec((1, d_out), lambda bi, si: (0, 0)),
            ],
            out_specs=pl.BlockSpec((1, seq_tile, d_out),
                                   lambda bi, si: (bi, si, 0)),
        ),
        compiler_params=pltpu.CompilerParams(
            dimension_semantics=("parallel", "parallel"),
            vmem_limit_bytes=_VMEM_LIMIT),
    )(x, w, b)


# ---------------------------------------------------------------------------
# Kernel 1b: fused K/V projection — kv activations read once, two matmuls,
# both weights resident, two lane-dense (B, S, D) outputs.
# ---------------------------------------------------------------------------
def _kv_proj_kernel(x_ref, wk_ref, bk_ref, wv_ref, bv_ref, k_ref, v_ref):
    x = x_ref[0]
    k = jnp.dot(x, wk_ref[...], preferred_element_type=jnp.float32) + bk_ref[...]
    v = jnp.dot(x, wv_ref[...], preferred_element_type=jnp.float32) + bv_ref[...]
    k_ref[0] = k.astype(k_ref.dtype)
    v_ref[0] = v.astype(v_ref.dtype)


def _kv_proj(x, wk, bk, wv, bv, *, seq_tile):
    B, S, D = x.shape
    return pl.pallas_call(
        _kv_proj_kernel,
        out_shape=(jax.ShapeDtypeStruct((B, S, D), x.dtype),
                   jax.ShapeDtypeStruct((B, S, D), x.dtype)),
        grid_spec=pltpu.PrefetchScalarGridSpec(
            num_scalar_prefetch=0,
            grid=(B, S // seq_tile),
            in_specs=[
                pl.BlockSpec((1, seq_tile, D), lambda bi, si: (bi, si, 0)),
                pl.BlockSpec((D, D), lambda bi, si: (0, 0)),       # resident
                pl.BlockSpec((1, D), lambda bi, si: (0, 0)),
                pl.BlockSpec((D, D), lambda bi, si: (0, 0)),       # resident
                pl.BlockSpec((1, D), lambda bi, si: (0, 0)),
            ],
            out_specs=[
                pl.BlockSpec((1, seq_tile, D), lambda bi, si: (bi, si, 0)),
                pl.BlockSpec((1, seq_tile, D), lambda bi, si: (bi, si, 0)),
            ],
        ),
        compiler_params=pltpu.CompilerParams(
            dimension_semantics=("parallel", "parallel"),
            vmem_limit_bytes=_VMEM_LIMIT),
    )(x, wk, bk, wv, bv)


# ---------------------------------------------------------------------------
# Kernel 2: flash-style cross attention + fused out-projection accumulation.
# grid = (B, q_tiles, head_groups, kv_tiles); online softmax over kv; `hg`
# heads are processed per step from lane-dense (.., hg*hd) tiles; per head
# group the normalized context is folded into the (resident) out projection.
# ---------------------------------------------------------------------------
def _flash_cross_attn_kernel(q_ref, k_ref, v_ref, mask_ref, wo_ref, bo_ref,
                             out_ref, m_scr, l_scr, acc_scr, out_acc,
                             *, heads_per_group, head_dim):
    g_idx = pl.program_id(2)
    kv_idx = pl.program_id(3)
    n_groups = pl.num_programs(2)
    n_kv = pl.num_programs(3)

    @pl.when(jnp.logical_and(g_idx == 0, kv_idx == 0))
    def _():
        out_acc[...] = jnp.zeros_like(out_acc)

    @pl.when(kv_idx == 0)
    def _():
        # -inf running max is safe because the additive mask is finite (-1e30
        # for pads); do not reuse this kernel with -inf masks.
        m_scr[...] = jnp.full_like(m_scr, -jnp.inf)
        l_scr[...] = jnp.zeros_like(l_scr)
        acc_scr[...] = jnp.zeros_like(acc_scr)

    q = q_ref[0]          # (tq, hg*hd), q-scaling folded into Wq/bq
    k = k_ref[0]          # (tk, hg*hd)
    v = v_ref[0]          # (tk, hg*hd), "/2" folded into Wv
    mask = mask_ref[0]    # (1, tk) compact or (tq, tk) dense; broadcasts

    for h in range(heads_per_group):
        sl = slice(h * head_dim, (h + 1) * head_dim)
        # (tq, hd) x (tk, hd) contracted on hd -> (tq, tk) NT matmul on MXU
        s = lax.dot_general(q[:, sl], k[:, sl], (((1,), (1,)), ((), ())),
                            preferred_element_type=jnp.float32)
        s = s + mask
        m_prev = m_scr[h]                                        # (tq, 1)
        m_new = jnp.maximum(m_prev, jnp.max(s, axis=-1, keepdims=True))
        alpha = jnp.exp(m_prev - m_new)
        p = jnp.exp(s - m_new)
        l_scr[h] = alpha * l_scr[h] + jnp.sum(p, axis=-1, keepdims=True)
        acc_scr[h] = alpha * acc_scr[h] + jnp.dot(
            p.astype(v.dtype), v[:, sl], preferred_element_type=jnp.float32)
        m_scr[h] = m_new

    # Finished this group's kv loop: fold the heads into the out projection.
    @pl.when(kv_idx == n_kv - 1)
    def _():
        ctx = jnp.concatenate(
            [acc_scr[h] * pl.reciprocal(l_scr[h], approx=True)
             for h in range(heads_per_group)], axis=-1)          # (tq, hg*hd)
        out_acc[...] += jnp.dot(ctx, wo_ref[g_idx],
                                preferred_element_type=jnp.float32)

    @pl.when(jnp.logical_and(g_idx == n_groups - 1, kv_idx == n_kv - 1))
    def _():
        out_ref[0] = (out_acc[...] + bo_ref[...]).astype(out_ref.dtype)


def cross_attention_pallas(hidden_states, key_value_states, attention_mask,
                           params, *, num_heads):
    """hidden_states: (B, Tq, D); key_value_states: (B, Ts, D);
    attention_mask: additive, broadcastable (torch-style) to (B, 1, Tq, Ts).
    Returns (attn_output, None) like CrossAttention.forward(return_attn_map=False)."""
    B, Tq, D = hidden_states.shape
    Ts = key_value_states.shape[1]
    H = num_heads
    hd = D // H
    if hd * H != D:
        raise ValueError("d_model must be divisible by num_heads")
    scaling = hd ** (-0.5)

    hg = _pick_head_group(H, hd)          # heads per lane-dense group
    n_hg = H // hg
    hgd = hg * hd

    # Tiles: pad sequences to 128-multiples (padded keys masked out) instead
    # of falling back to a monolithic tile; use 512/256-wide kv tiles when
    # divisibility allows.
    Tq_pad = _round_up(Tq, 128)
    tq = 256 if Tq_pad % 256 == 0 else 128
    Ts_pad = _round_up(Ts, 128)
    tk = 512 if Ts_pad % 512 == 0 else (256 if Ts_pad % 256 == 0 else 128)

    hs = hidden_states
    kvs = key_value_states
    if Tq_pad != Tq:
        hs = jnp.pad(hs, ((0, 0), (0, Tq_pad - Tq), (0, 0)))
    if Ts_pad != Ts:
        kvs = jnp.pad(kvs, ((0, 0), (0, Ts_pad - Ts), (0, 0)))

    # ---- glue: torch (out, in) weights -> right-multiply layouts; fold the
    # query scaling into Wq/bq and the "/2" of v_proj(kv/2) into Wv. ----
    wq = params['q_w'].T * scaling
    bq = (params['q_b'] * scaling).reshape(1, D)
    wk = params['k_w'].T
    bk = params['k_b'].reshape(1, D)
    wv = params['v_w'].T * 0.5
    bv = params['v_b'].reshape(1, D)
    wo = params['o_w'].T.reshape(n_hg, hgd, D)   # per-head-group out proj
    bo = params['o_b'].reshape(1, D)

    # ---- dense lane-packed projections (kernel 1) ----
    q = _dense_proj(hs, wq, bq, seq_tile=tq)               # (B, Tq_pad, D)
    k, v = _kv_proj(kvs, wk, bk, wv, bv, seq_tile=tk)      # (B, Ts_pad, D) x2

    # ---- additive mask: stream compact (B,1,Ts) when it does not vary per
    # query; never pre-broadcast a (B,1,Tq,Ts) f32 tensor. ----
    m = jnp.asarray(attention_mask, jnp.float32)
    m = jnp.reshape(m, (1,) * (4 - m.ndim) + m.shape)      # torch-style broadcast
    if m.shape[1] != 1:
        # TODO(synk): per-head additive masks are not supported by this kernel.
        raise NotImplementedError("per-head attention_mask is not supported")
    compact = m.shape[2] == 1
    q_extent = 1 if compact else Tq
    m = jnp.broadcast_to(m, (B, 1, q_extent, Ts))[:, 0]    # (B, q_extent, Ts)
    if Ts_pad != Ts:
        m = jnp.pad(m, ((0, 0), (0, 0), (0, Ts_pad - Ts)), constant_values=_NEG)
    if (not compact) and Tq_pad != Tq:
        m = jnp.pad(m, ((0, 0), (0, Tq_pad - Tq), (0, 0)))
    if compact:
        mask_spec = pl.BlockSpec((1, 1, tk), lambda b, qi, g, ki: (b, 0, ki))
    else:
        mask_spec = pl.BlockSpec((1, tq, tk), lambda b, qi, g, ki: (b, qi, ki))

    grid = (B, Tq_pad // tq, n_hg, Ts_pad // tk)
    kernel = functools.partial(_flash_cross_attn_kernel,
                               heads_per_group=hg, head_dim=hd)

    out = pl.pallas_call(
        kernel,
        out_shape=jax.ShapeDtypeStruct((B, Tq_pad, D), hidden_states.dtype),
        grid_spec=pltpu.PrefetchScalarGridSpec(
            num_scalar_prefetch=0,
            grid=grid,
            in_specs=[
                pl.BlockSpec((1, tq, hgd), lambda b, qi, g, ki: (b, qi, g)),
                pl.BlockSpec((1, tk, hgd), lambda b, qi, g, ki: (b, ki, g)),
                pl.BlockSpec((1, tk, hgd), lambda b, qi, g, ki: (b, ki, g)),
                mask_spec,
                pl.BlockSpec((n_hg, hgd, D), lambda b, qi, g, ki: (0, 0, 0)),  # Wo resident
                pl.BlockSpec((1, D), lambda b, qi, g, ki: (0, 0)),
            ],
            out_specs=pl.BlockSpec((1, tq, D), lambda b, qi, g, ki: (b, qi, 0)),
            scratch_shapes=[
                pltpu.VMEM((hg, tq, 1), jnp.float32),   # running row max / head
                pltpu.VMEM((hg, tq, 1), jnp.float32),   # running denom / head
                pltpu.VMEM((hg, tq, hd), jnp.float32),  # per-head context accum
                pltpu.VMEM((tq, D), jnp.float32),       # out-projection accum
            ],
        ),
        compiler_params=pltpu.CompilerParams(
            dimension_semantics=("parallel", "parallel",
                                 "arbitrary", "arbitrary"),
            vmem_limit_bytes=_VMEM_LIMIT),
    )(q, k, v, m, wo, bo)

    out = out[:, :Tq, :]
    # dropout p == 0.0 in this module -> no-op.
    # TODO(synk): return_attn_map=True (averaged attention weights) not
    # implemented -- it requires materializing the full (H, Tq, Ts) map.
    return out, None


# ---------------------------------------------------------------------------
# Pure-JAX reference (mirrors the PyTorch forward exactly)
# ---------------------------------------------------------------------------
def _reference_jax(hidden_states, key_value_states, attention_mask, params,
                   *, num_heads):
    B, Tq, D = hidden_states.shape
    Ts = key_value_states.shape[1]
    hd = D // num_heads
    scaling = hd ** (-0.5)
    lin = lambda x, w, b: x @ w.T + b
    q = lin(hidden_states, params['q_w'], params['q_b']) * scaling
    k = lin(key_value_states, params['k_w'], params['k_b'])
    v = lin(key_value_states / 2, params['v_w'], params['v_b'])
    q = q.reshape(B, Tq, num_heads, hd).transpose(0, 2, 1, 3)
    k = k.reshape(B, Ts, num_heads, hd).transpose(0, 2, 1, 3)
    v = v.reshape(B, Ts, num_heads, hd).transpose(0, 2, 1, 3)
    w = jnp.einsum('bhtd,bhsd->bhts', q, k) + attention_mask
    w = jax.nn.softmax(w, axis=-1)
    ctx = jnp.einsum('bhts,bhsd->bhtd', w, v)
    ctx = ctx.transpose(0, 2, 1, 3).reshape(B, Tq, D)
    return lin(ctx, params['o_w'], params['o_b'])


if __name__ == "__main__":
    B, Tq, Ts, D, H = 2, 8, 16, 32, 4

    key = jax.random.PRNGKey(0)
    keys = jax.random.split(key, 10)
    s = 0.1
    params = {
        'q_w': jax.random.normal(keys[0], (D, D), jnp.float32) * s,
        'q_b': jax.random.normal(keys[1], (D,), jnp.float32) * s,
        'k_w': jax.random.normal(keys[2], (D, D), jnp.float32) * s,
        'k_b': jax.random.normal(keys[3], (D,), jnp.float32) * s,
        'v_w': jax.random.normal(keys[4], (D, D), jnp.float32) * s,
        'v_b': jax.random.normal(keys[5], (D,), jnp.float32) * s,
        'o_w': jax.random.normal(keys[6], (D, D), jnp.float32) * s,
        'o_b': jax.random.normal(keys[7], (D,), jnp.float32) * s,
    }

    hidden = jax.random.normal(keys[8], (B, Tq, D), jnp.float32)
    kv_states = jax.random.normal(keys[9], (B, Ts, D), jnp.float32)

    # Additive key-padding mask, broadcastable over heads/queries: (B,1,1,Ts).
    src_lens = jnp.array([Ts, Ts - 4], jnp.int32)
    valid = jnp.arange(Ts)[None, :] < src_lens[:, None]            # (B, Ts)
    attention_mask = jnp.where(valid, 0.0, -1e9).astype(jnp.float32)
    attention_mask = attention_mask[:, None, None, :]              # (B,1,1,Ts)

    out, attn_map = cross_attention_pallas(hidden, kv_states, attention_mask,
                                           params, num_heads=H)
    out = jax.block_until_ready(out)

    ref = _reference_jax(hidden, kv_states, attention_mask, params,
                         num_heads=H)
    assert out.shape == (B, Tq, D)
    assert attn_map is None
    assert jnp.allclose(out, ref, atol=2e-3, rtol=2e-3), "mismatch vs reference"

    print("KERNEL_OK")
</pallas_src>

<mosaic_0001>
module attributes {stable_mosaic.version = 11 : i64} {
  func.func @_dense_proj_kernel(%arg0: i32, %arg1: i32, %arg2: memref<1x128x32xf32, #tpu.memory_space<vmem>>, %arg3: memref<32x32xf32, #tpu.memory_space<vmem>>, %arg4: memref<1x32xf32, #tpu.memory_space<vmem>>, %arg5: memref<1x128x32xf32, #tpu.memory_space<vmem>>) attributes {dimension_semantics = [#tpu.dimension_semantics<parallel>, #tpu.dimension_semantics<parallel>], iteration_bounds = array<i64: 2, 1>, scalar_prefetch = 0 : i64, scratch_operands = 0 : i64, tpu.core_type = #tpu.core_type<tc>, window_params = [{transform_indices = @transform_0, window_bounds = array<i64: 1, 128, 32>}, {pipeline_mode = #tpu.pipeline_mode<synchronous>, transform_indices = @transform_1, window_bounds = array<i64: 32, 32>}, {pipeline_mode = #tpu.pipeline_mode<synchronous>, transform_indices = @transform_2, window_bounds = array<i64: 1, 32>}, {transform_indices = @transform_3, window_bounds = array<i64: 1, 128, 32>}]} {
    %c0 = arith.constant 0 : index
    %c0_0 = arith.constant 0 : index
    %c0_1 = arith.constant 0 : index
    %0 = vector.load %arg2[%c0, %c0_0, %c0_1] : memref<1x128x32xf32, #tpu.memory_space<vmem>>, vector<1x128x32xf32>
    %1 = vector.shape_cast %0 : vector<1x128x32xf32> to vector<128x32xf32>
    %c0_2 = arith.constant 0 : index
    %c0_3 = arith.constant 0 : index
    %2 = vector.load %arg3[%c0_2, %c0_3] : memref<32x32xf32, #tpu.memory_space<vmem>>, vector<32x32xf32>
    %cst = arith.constant dense<0.000000e+00> : vector<128x32xf32>
    %3 = tpu.matmul %1, %2, %cst {dimension_numbers = #tpu.dot_dimension_numbers<[1], [0], [0], [1], [0, 0, 1, 1], [], []>} : vector<128x32xf32>, vector<32x32xf32>, vector<128x32xf32> -> vector<128x32xf32>
    %c0_4 = arith.constant 0 : index
    %c0_5 = arith.constant 0 : index
    %4 = vector.load %arg4[%c0_4, %c0_5] : memref<1x32xf32, #tpu.memory_space<vmem>>, vector<1x32xf32>
    %5 = vector.broadcast %4 : vector<1x32xf32> to vector<128x32xf32>
    %6 = arith.addf %3, %5 : vector<128x32xf32>
    %c0_6 = arith.constant 0 : index
    %c0_7 = arith.constant 0 : index
    %c0_8 = arith.constant 0 : index
    %7 = vector.load %arg5[%c0_6, %c0_7, %c0_8] : memref<1x128x32xf32, #tpu.memory_space<vmem>>, vector<1x128x32xf32>
    %8 = vector.shape_cast %7 : vector<1x128x32xf32> to vector<128x32xf32>
    %9 = vector.shape_cast %6 : vector<128x32xf32> to vector<1x128x32xf32>
    tpu.vector_store %arg5[%c0_6, %c0_7, %c0_8], %9 {strides = array<i32>} : memref<1x128x32xf32, #tpu.memory_space<vmem>>, vector<1x128x32xf32>,
    return
  }
  func.func @transform_0(%arg0: i32, %arg1: i32) -> (i32, i32, i32) {
    %c0_i32 = arith.constant 0 : i32
    %c0_i32_0 = arith.constant 0 : i32
    return %arg0, %arg1, %c0_i32 : i32, i32, i32
  }
  func.func @transform_1(%arg0: i32, %arg1: i32) -> (i32, i32) {
    %c0_i32 = arith.constant 0 : i32
    %c0_i32_0 = arith.constant 0 : i32
    %c0_i32_1 = arith.constant 0 : i32
    return %c0_i32, %c0_i32_0 : i32, i32
  }
  func.func @transform_2(%arg0: i32, %arg1: i32) -> (i32, i32) {
    %c0_i32 = arith.constant 0 : i32
    %c0_i32_0 = arith.constant 0 : i32
    %c0_i32_1 = arith.constant 0 : i32
    return %c0_i32, %c0_i32_0 : i32, i32
  }
  func.func @transform_3(%arg0: i32, %arg1: i32) -> (i32, i32, i32) {
    %c0_i32 = arith.constant 0 : i32
    %c0_i32_0 = arith.constant 0 : i32
    return %arg0, %arg1, %c0_i32 : i32, i32, i32
  }
}

</mosaic_0001>

<bundles_post_ra>
// kernel: tpu_custom_call.1
= control target key start
LH: loop header
LB: loop body
LE: loop exit
PB: predicated region body
PF: predicated region fallthrough
CT: control target
= control target key end

     0   :  { %8 = vsyncpa [#allocation3], 0  ;;  %s1321_s0 = inlined_call_operand.hbm [shape: f32[2,128,32], index: 0, kind: input, shape index: {}]   ;;  %s1322_s1 = inlined_call_operand.hbm [shape: f32[32,32], index: 1, kind: input, shape index: {}]   ;;  %s1323_s2 = inlined_call_operand.hbm [shape: f32[1,32], index: 2, kind: input, shape index: {}]   ;;  %s1324_s3 = inlined_call_operand.hbm [shape: f32[2,128,32], index: 3, kind: output, shape index: {}]  }
   0x1   :  { %10 = vsyncpa [#allocation3 + $0x1], 0 }
   0x2   :  { %11 = vsyncpa [#allocation6], 0 }
   0x3   :  { %12 = vsyncpa [#allocation4], 0 }
   0x4   :  { %14 = vsyncpa [#allocation4 + $0x1], 0  ;;  %s986_s12 = smov 0   ;;  %s988_s13 = smov 0  }
   0x5   :  { %s990_s14 = smov 0   ;;  %s992_s15 = smov 0  }
   0x6   :  { %s994_s16 = smov 0   ;;  %s996_s17 = smov 0  }
   0x7 LB: > { %s595_s18 = sadd.s32 4294967295, %s956_s17   ;;  %s596_s19 = sadd.s32 4294967294, %s956_s17   ;;  %s956_s17 = sphi %s996_s17, %s20_s17   ;;  %s952_s16 = sphi %s994_s16, %s1346_s16   ;;  %s948_s15 = sphi %s992_s15, %s1345_s15   ;;  %s944_s14 = sphi %s990_s14, %s1344_s14   ;;  %s940_s13 = sphi %s988_s13, %s1343_s13   ;;  %s936_s12 = sphi %s986_s12, %s1342_s12  }
   0x8   : > { %p54_p0 = scmp.ne.s32.totalorder %s940_s13, %s936_s12  ;;  %p1020_p1 = scmp.eq.s32.totalorder %s595_s18, 0 }
   0x9   : > { %p1024_p2 = scmp.eq.s32.totalorder %s595_s18, 1  ;;  %p128_p3 = scmp.eq.s32.totalorder %s596_s19, 1 }
   0xa   : > { %s1329_s20 = scalar_select %p1020_p1, 1, 0 }
   0xb   : > { %p1030_p4 = por %p1020_p1, %p54_p0  ;;  %p597_p5 = scmp.ge.s32.totalorder %s956_s17, 1 }
   0xc   : > { %p1035_p6 = por %p128_p3, %p54_p0  ;;  %p135_p7 = scmp.lt.s32.totalorder %s956_s17, 3 }
   0xd   : > { %s1331_s22 = scalar_select %p1030_p4, 1, 0 }
   0xe   : > { %s1332_s23 = scalar_select %p1035_p6, 1, 0 }
   0xf   : > { %p1040_p8 = pnand %p597_p5, %p135_p7  ;;  %s958_s25 = smov [#allocation5]  }
  0x10   : > { %s147_s26 = sshll.u32 %s958_s25, 4  ;;  %s959_s28 = smov [#allocation7]   ;;  %s1044_s26 = int_to_ptr.vmem [resolvable:$true] %s147_s26 }
  0x11   : > { %p709_p9 = pneg %p1040_p8  ;;  %s161_s29 = sshll.u32 %s959_s28, 4  ;;  %s1055_s29 = int_to_ptr.vmem [resolvable:$true] %s161_s29 }
  0x12   : > { %s784_s5 = scalar_lea.hbm %s1322_s1, 512 }
  0x13   : > { %p1051_p11 = pnand %p709_p9, %p1020_p1  ;;  %p785_p12 = scmp.ne.s32.totalorder %s1322_s1, %s784_s5 }
  0x14   : > { %p791_p5 = scmp.lt.u32.totalorder %s784_s5, %s1322_s1 }
  0x15   : > { %p786_p13 = pneg %p1051_p11 }
  0x17   : > { %p787_p0 = pnand %p786_p13, %p785_p12 }
  0x19   : > { %p788_p3 = pneg %p787_p0 }
  0x1b   : > { %p793_p7 = pnand %p791_p5, %p788_p3 }
  0x1d   : > { %796 = shalt.err (!%p793_p7)
}
  0x1e   : > { %s797_s10 = scalar_lea.vmem %s1044_s26, 512  ;;  %p805_p1 = scmp.lt.s32.totalorder %s1044_s26, %s1044_s26 }
  0x1f   : > { %p798_p9 = scmp.ne.s32.totalorder %s1044_s26, %s797_s10  ;;  %p806_p12 = scmp.lt.s32.totalorder %s797_s10, %s797_s10 }
  0x21   : > { %p800_p10 = pnand %p798_p9, %p786_p13  ;;  %p807_p0 = por %p806_p12, %p805_p1 }
  0x23   : > { %p801_p6 = pneg %p800_p10 }
  0x25   : > { %p808_p4 = pnand %p807_p0, %p801_p6 }
  0x27   : > { %811 = shalt.err (!%p808_p4)
}
  0x28   : > { %s960_s11 = smov 128   ;;  %s961_s18 = smov 8  }
  0x29   : > { %712 = dma.hbm_to_vmem [thread:$0]  (!%p1051_p11), %s1322_s1, 512, %s1044_s26, [#allocation6], %s960_s11, %s960_s11, %s961_s18  }
  0x2a   : > { %s812_s4 = scalar_lea.hbm %s1323_s2, 16 }
  0x2b   : > { %p813_p1 = scmp.ne.s32.totalorder %s1323_s2, %s812_s4  ;;  %p819_p10 = scmp.lt.u32.totalorder %s812_s4, %s1323_s2 }
  0x2d   : > { %p815_p4 = pnand %p813_p1, %p786_p13 }
  0x2f   : > { %p816_p6 = pneg %p815_p4 }
  0x31   : > { %p821_p3 = pnand %p819_p10, %p816_p6 }
  0x33   : > { %824 = shalt.err (!%p821_p3)
}
  0x34   : > { %s825_s26 = scalar_lea.vmem %s1055_s29, 16  ;;  %s832_s9 = scalar_lea.vmem %s1055_s29, 32 }
  0x35   : > { %p826_p5 = scmp.ne.s32.totalorder %s1055_s29, %s825_s26  ;;  %p833_p12 = scmp.lt.s32.totalorder %s1055_s29, %s1055_s29 }
  0x36   : > { %p834_p0 = scmp.lt.s32.totalorder %s832_s9, %s825_s26 }
  0x37   : > { %p828_p7 = pnand %p826_p5, %p786_p13 }
  0x38   : > { %p835_p1 = por %p834_p0, %p833_p12 }
  0x39   : > { %p829_p9 = pneg %p828_p7 }
  0x3b   : > { %p836_p4 = pnand %p835_p1, %p829_p9 }
  0x3d   : > { %839 = shalt.err (!%p836_p4)
}
  0x3e   : > { %715 = dma.hbm_to_vmem [thread:$0]  (!%p1051_p11), %s1323_s2, 16, %s1055_s29, [#allocation6]  }
  0x3f   : > { %s32_s25 = sadd.s32 1, %s952_s16  ;;  %s41_s28 = sadd.s32 1, %s944_s14 }
  0x40   : > { %p34_p13 = scmp.ge.s32.totalorder %s32_s25, 2  ;;  %p48_p6 = scmp.ne.s32.totalorder %s944_s14, %s940_s13 }
  0x41   : > { %p49_p10 = scmp.eq.s32.totalorder %s956_s17, 0  ;;  %p726_p3 = scmp.lt.s32.totalorder %s956_s17, 2 }
  0x42   : > { %s1348_s25 = smov (%p34_p13, %s32_s25), 0  ;;  %p1123_p7 = por %p1024_p2, %p48_p6 }
  0x43   : > { %p50_p5 = por %p49_p10, %p48_p6  ;;  %s36_s30 = ssub.s32 %s952_s16, %s1348_s25 }
  0x44   : > { %s1335_s27 = scalar_select %p1123_p7, 1, 0 }
  0x45   : > { %s172_s4 = sand.u32 1, %s944_s14   ;;  %p39_p9 = scmp.eq.s32.totalorder %s36_s30, 0 }
  0x46   : > { %s601_s29 = sshll.u32 %s172_s4, 7  ;;  %s631_s5 = sshll.u32 %s952_s16, 11 }
  0x47   : > { %s1132_s6 = scalar_select %p39_p9, %s944_s14, %s41_s28  }
  0x48   : > { %s1137_s26 = scalar_lea.hbm %s1321_s0, %s631_s5  ;;  %s176_s21 = scalar_lea.vmem [#allocation2], %s601_s29 }
  0x49   : > { %s185_s9 = sshll.u32 %s176_s21, 4  ;;  %p1141_p2 = pnand %p726_p3, %p50_p5  ;;  %s1145_s9 = int_to_ptr.vmem [resolvable:$true] %s185_s9 }
  0x4a   : > { %s1147_s19 = scalar_lea.sflag [#allocation3], %s172_s4  ;;  %s840_s28 = scalar_lea.hbm %s1137_s26, 2048 }
  0x4b   : > { %p841_p11 = scmp.ne.s32.totalorder %s1137_s26, %s840_s28  ;;  %p842_p12 = pneg %p1141_p2 }
  0x4c   : > { %s845_s5 = scalar_lea.hbm %s1321_s0, 4096  ;;  %p846_p4 = scmp.lt.u32.totalorder %s1137_s26, %s1321_s0 }
  0x4d   : > { %p843_p0 = pnand %p842_p12, %p841_p11  ;;  %p847_p13 = scmp.lt.u32.totalorder %s845_s5, %s840_s28 }
  0x4e   : > { %p849_p10 = scmp.lt.u32.totalorder %s840_s28, %s1137_s26 }
  0x4f   : > { %p844_p1 = pneg %p843_p0  ;;  %p848_p6 = por %p847_p13, %p846_p4 }
  0x51   : > { %p850_p3 = por %p849_p10, %p848_p6 }
  0x53   : > { %p851_p5 = pnand %p850_p3, %p844_p1 }
  0x55   : > { %854 = shalt.err (!%p851_p5)
}
  0x56   : > { %s855_s4 = scalar_lea.vmem %s1145_s9, 2048  ;;  %s962_s21 = smov [#allocation2]  }
  0x57   : > { %p856_p9 = scmp.ne.s32.totalorder %s1145_s9, %s855_s4  ;;  %s860_s30 = sshll.u32 %s962_s21, 4  ;;  %s861_s30 = int_to_ptr.vmem [resolvable:$false] %s860_s30 }
  0x58   : > { %s862_s29 = scalar_lea.vmem %s861_s30, 4096  ;;  %p863_p7 = scmp.lt.s32.totalorder %s1145_s9, %s861_s30 }
  0x59   : > { %p858_p11 = pnand %p856_p9, %p842_p12  ;;  %p864_p4 = scmp.lt.s32.totalorder %s862_s29, %s855_s4 }
  0x5b   : > { %p859_p0 = pneg %p858_p11  ;;  %p865_p13 = por %p864_p4, %p863_p7 }
  0x5d   : > { %p866_p6 = pnand %p865_p13, %p859_p0 }
  0x5f   : > { %869 = shalt.err (!%p866_p6)
}
  0x60   : > { %719 = dma.hbm_to_vmem [thread:$0]  (!%p1141_p2), %s1137_s26, 2048, %s1145_s9, %s1147_s19, %s960_s11, %s960_s11, %s961_s18  }
  0x61   : > { %197 = sbr.rel (%p1040_p8) target bundleno = 362 (0x16a), region = 32  ;;  %s1181_s28 = sand.u32 (!%p1040_p8), 1, %s940_s13  }
  0x62   : > { %s605_s5 = sshll.u32 (!%p1040_p8), %s1181_s28, 7  ;;  %s200_s7 = scalar_lea.sflag (!%p1040_p8), [#allocation3], %s1181_s28 }
  0x63   : > { %s1187_s10 = scalar_lea.vmem (!%p1040_p8), [#allocation2], %s605_s5  ;;  %p1337_p7 = scmp.ne.s32.totalorder (!%p1040_p8), %s1331_s22, 0 }
  0x68   : > { %923 = dma.done.wait (%p1337_p7), %s200_s7, 2048  }
  0x69   : > { %925 = vsyncadd (%p1337_p7), %s200_s7, 4294965248  ;;  %p1338_p2 = scmp.ne.s32.totalorder %s1329_s20, 0 }
  0x6b   : > { %927 = dma.done.wait (%p1338_p2), [#allocation6], 528  }
  0x6c   : > { %929 = vsyncadd (%p1338_p2), [#allocation6], 4294966768  ;;  %vm263_vm0 = vcmask 261120   ;;  %v252_v0 = vld [vmem:[#allocation5] sm:$0xff]  ;;  %v253_v1 = vld [vmem:[#allocation5 + $0x8] sm:$0xff]  ;;  %s1231_s20 = scalar_lea.vmem [#allocation8], %s605_s5 }
  0x6d   : > { %v254_v2 = vld [vmem:[#allocation5 + $0x10] sm:$0xff]  ;;  %v685_v3 = vpack.c.bf16 %v253_v1, %v252_v0  ;;  %v255_v4 = vld [vmem:[#allocation5 + $0x18] sm:$0xff]  ;;  %v236_v5 = vld [vmem:[%s1187_s10] sm:$0xff]  ;;  %s632_s22 = sshll.u32 %s948_s15, 11  ;;  %s489_s24 = sshll.u32 %s1231_s20, 4  ;;  %s1264_s24 = int_to_ptr.vmem [resolvable:$true] %s489_s24 }
  0x6e   : > { %v244_v6 = vld [vmem:[%s1187_s10 + $0x40] sm:$0xff]  ;;  %v689_v7 = vpack.c.bf16 %v255_v4, %v254_v2  ;;  %661 = vmatprep.mubr.msk.f32.mxu0 %vm263_vm0, %v236_v5  ;;  %v237_v8 = vld [vmem:[%s1187_s10 + $0x8] sm:$0xff]  ;;  %v238_v10 = vld [vmem:[%s1187_s10 + $0x10] sm:$0xff]  ;;  %s1262_s18 = scalar_lea.hbm %s1324_s3, %s632_s22  ;;  %s474_s26 = scalar_lea.sflag [#allocation4], %s1181_s28 }
  0x6f   : > { %673 = vmatprep.mubr.msk.f32.mxu1 %vm263_vm0, %v244_v6  ;;  %686 = vmatprep.subr.bf16.mxu0 %v685_v3  ;;  %v245_v9 = vld [vmem:[%s1187_s10 + $0x48] sm:$0xff]  ;;  %v246_v11 = vld [vmem:[%s1187_s10 + $0x50] sm:$0xff]  ;;  %v239_v12 = vld [vmem:[%s1187_s10 + $0x18] sm:$0xff]  ;;  %s870_s9 = scalar_lea.vmem %s1264_s24, 2048  ;;  %p1339_p12 = scmp.ne.s32.totalorder %s1335_s27, 0 }
  0x70   : > { %693 = vmatprep.subr.bf16.mxu1 %v685_v3  ;;  %688 = vmatpush3.bf16.msra.mxu0 %v685_v3  ;;  %v247_v13 = vld [vmem:[%s1187_s10 + $0x58] sm:$0xff]  ;;  %v240_v14 = vld [vmem:[%s1187_s10 + $0x20] sm:$0xff]  ;;  %v241_v16 = vld [vmem:[%s1187_s10 + $0x28] sm:$0xff]  ;;  %p871_p8 = scmp.ne.s32.totalorder %s1264_s24, %s870_s9  ;;  %s963_s19 = smov [#allocation8]  }
  0x71   : > { %695 = vmatpush3.bf16.msra.mxu1 %v685_v3  ;;  %690 = vmatprep.subr.bf16.mxu0 %v689_v7  ;;  %v248_v15 = vld [vmem:[%s1187_s10 + $0x60] sm:$0xff]  ;;  %v249_v17 = vld [vmem:[%s1187_s10 + $0x68] sm:$0xff]  ;;  %v242_v18 = vld [vmem:[%s1187_s10 + $0x30] sm:$0xff]  ;;  %s874_s8 = sshll.u32 %s963_s19, 4  ;;  %s875_s8 = int_to_ptr.vmem [resolvable:$false] %s874_s8 }
  0x72   : > { %694 = vmatprep.subr.bf16.mxu1 %v689_v7  ;;  %v250_v19 = vld [vmem:[%s1187_s10 + $0x70] sm:$0xff]  ;;  %v243_v20 = vld [vmem:[%s1187_s10 + $0x38] sm:$0xff]  ;;  %v609_v22 = vld [vmem:[#allocation7] ss:$0 sm:$0xff]  ;;  %p872_p1 = pnand %p871_p8, %p1339_p12  ;;  %s876_s4 = scalar_lea.vmem %s875_s8, 4096 }
  0x73   : > { %v251_v21 = vld [vmem:[%s1187_s10 + $0x78] sm:$0xff]  ;;  %p877_p3 = scmp.lt.s32.totalorder %s1264_s24, %s875_s8  ;;  %p878_p5 = scmp.lt.s32.totalorder %s876_s4, %s870_s9 }
  0x74   : > { %692 = vmatpush3.bf16.msra.mxu0 %v689_v7  ;;  %p873_p10 = pneg %p872_p1 }
  0x75   : > { %696 = vmatpush3.bf16.msra.mxu1 %v689_v7  ;;  %p879_p9 = por %p878_p5, %p877_p3 }
  0x77   : > { %662 = vmatmul.mubr.msk.f32.vlgmr.msra.gmra.mrb[0].mxu0 %vm263_vm0, %v237_v8  ;;  %p880_p11 = pnand %p879_p9, %p873_p10 }
  0x78   : > { %674 = vmatmul.mubr.msk.f32.vlgmr.msra.gmra.mrb[0].mxu1 %vm263_vm0, %v245_v9  ;;  %664 = vmatprep.mubr.msk.f32.mxu0 %vm263_vm0, %v238_v10 }
  0x79   : > { %676 = vmatprep.mubr.msk.f32.mxu1 %vm263_vm0, %v246_v11 }
  0x7b   : > { %665 = vmatmul.mubr.msk.f32.gmra.mrb[2].mxu0 %vm263_vm0, %v239_v12 }
  0x7c   : > { %677 = vmatmul.mubr.msk.f32.gmra.mrb[2].mxu1 %vm263_vm0, %v247_v13  ;;  %667 = vmatprep.mubr.msk.f32.mxu0 %vm263_vm0, %v240_v14 }
  0x7d   : > { %679 = vmatprep.mubr.msk.f32.mxu1 %vm263_vm0, %v248_v15 }
  0x7f   : > { %668 = vmatmul.mubr.msk.f32.gmra.mrb[4].mxu0 %vm263_vm0, %v241_v16 }
  0x80   : > { %680 = vmatmul.mubr.msk.f32.gmra.mrb[4].mxu1 %vm263_vm0, %v249_v17  ;;  %670 = vmatprep.mubr.msk.f32.mxu0 %vm263_vm0, %v242_v18 }
  0x81   : > { %682 = vmatprep.mubr.msk.f32.mxu1 %vm263_vm0, %v250_v19 }
  0x83   : > { %671 = vmatmul.mubr.msk.f32.gmra.mrb[6].mxu0 %vm263_vm0, %v243_v20 }
  0x84   : > { %683 = vmatmul.mubr.msk.f32.gmra.mrb[6].mxu1 %vm263_vm0, %v251_v21 }
 0x14a   : > { %v663_v23 = vpop.f32.mrb[0].mxu0 }
 0x14b   : > { %v675_v24 = vpop.f32.mrb[0].mxu1  ;;  %v384_v25 = vadd.f32 %v663_v23, %v609_v22  ;;  %v378_v27 = vpop.f32.mrb[1].mxu0 }
 0x14c   : > { %v424_v26 = vadd.f32 %v675_v24, %v609_v22  ;;  %v418_v28 = vpop.f32.mrb[1].mxu1  ;;  %v379_v29 = vadd.f32 %v609_v22, %v378_v27 }
 0x14d   : > { %v419_v30 = vadd.f32 %v609_v22, %v418_v28  ;;  %458 = vst.msk [vmem:[%s1231_s20 + $0x8] sm:$0xff] %vm263_vm0, %v384_v25 }
 0x14e   : > { %466 = vst.msk [vmem:[%s1231_s20 + $0x48] sm:$0xff] %vm263_vm0, %v424_v26  ;;  %457 = vst.msk [vmem:[%s1231_s20] sm:$0xff] %vm263_vm0, %v379_v29  ;;  %v666_v31 = vpop.f32.mrb[2].mxu0 }
 0x14f   : > { %465 = vst.msk [vmem:[%s1231_s20 + $0x40] sm:$0xff] %vm263_vm0, %v419_v30  ;;  %v678_v32 = vpop.f32.mrb[2].mxu1  ;;  %v394_v33 = vadd.f32 %v666_v31, %v609_v22  ;;  %v388_v35 = vpop.f32.mrb[3].mxu0 }
 0x150   : > { %v434_v34 = vadd.f32 %v678_v32, %v609_v22  ;;  %v428_v36 = vpop.f32.mrb[3].mxu1  ;;  %v389_v37 = vadd.f32 %v609_v22, %v388_v35 }
 0x151   : > { %v429_v38 = vadd.f32 %v609_v22, %v428_v36  ;;  %460 = vst.msk [vmem:[%s1231_s20 + $0x18] sm:$0xff] %vm263_vm0, %v394_v33 }
 0x152   : > { %468 = vst.msk [vmem:[%s1231_s20 + $0x58] sm:$0xff] %vm263_vm0, %v434_v34  ;;  %459 = vst.msk [vmem:[%s1231_s20 + $0x10] sm:$0xff] %vm263_vm0, %v389_v37  ;;  %v669_v39 = vpop.f32.mrb[4].mxu0 }
 0x153   : > { %467 = vst.msk [vmem:[%s1231_s20 + $0x50] sm:$0xff] %vm263_vm0, %v429_v38  ;;  %v681_v40 = vpop.f32.mrb[4].mxu1  ;;  %v404_v41 = vadd.f32 %v669_v39, %v609_v22  ;;  %v398_v43 = vpop.f32.mrb[5].mxu0 }
 0x154   : > { %v444_v42 = vadd.f32 %v681_v40, %v609_v22  ;;  %v438_v44 = vpop.f32.mrb[5].mxu1  ;;  %v399_v45 = vadd.f32 %v609_v22, %v398_v43 }
 0x155   : > { %v439_v46 = vadd.f32 %v609_v22, %v438_v44  ;;  %462 = vst.msk [vmem:[%s1231_s20 + $0x28] sm:$0xff] %vm263_vm0, %v404_v41 }
 0x156   : > { %470 = vst.msk [vmem:[%s1231_s20 + $0x68] sm:$0xff] %vm263_vm0, %v444_v42  ;;  %461 = vst.msk [vmem:[%s1231_s20 + $0x20] sm:$0xff] %vm263_vm0, %v399_v45  ;;  %v672_v47 = vpop.f32.mrb[6].mxu0 }
 0x157   : > { %469 = vst.msk [vmem:[%s1231_s20 + $0x60] sm:$0xff] %vm263_vm0, %v439_v46  ;;  %v684_v48 = vpop.f32.mrb[6].mxu1  ;;  %v414_v49 = vadd.f32 %v672_v47, %v609_v22  ;;  %v408_v51 = vpop.f32.mrb[7].mxu0 }
 0x158   : > { %v454_v50 = vadd.f32 %v684_v48, %v609_v22  ;;  %v448_v52 = vpop.f32.mrb[7].mxu1  ;;  %v409_v53 = vadd.f32 %v609_v22, %v408_v51 }
 0x159   : > { %v449_v54 = vadd.f32 %v609_v22, %v448_v52  ;;  %464 = vst.msk [vmem:[%s1231_s20 + $0x38] sm:$0xff] %vm263_vm0, %v414_v49 }
 0x15a   : > { %472 = vst.msk [vmem:[%s1231_s20 + $0x78] sm:$0xff] %vm263_vm0, %v454_v50  ;;  %463 = vst.msk [vmem:[%s1231_s20 + $0x30] sm:$0xff] %vm263_vm0, %v409_v53 }
 0x15b   : > { %471 = vst.msk [vmem:[%s1231_s20 + $0x70] sm:$0xff] %vm263_vm0, %v449_v54 }
 0x15c   : > { %883 = shalt.err (!%p880_p11)
}
 0x15d   : > { %s884_s21 = scalar_lea.hbm %s1262_s18, 2048  ;;  %s888_s5 = scalar_lea.hbm %s1324_s3, 4096 }
 0x15e   : > { %p885_p0 = scmp.ne.s32.totalorder %s1262_s18, %s884_s21  ;;  %p889_p6 = scmp.lt.u32.totalorder %s1262_s18, %s1324_s3 }
 0x15f   : > { %p890_p7 = scmp.lt.u32.totalorder %s888_s5, %s884_s21  ;;  %p892_p8 = scmp.lt.u32.totalorder %s884_s21, %s1262_s18 }
 0x160   : > { %p886_p4 = pnand %p885_p0, %p1339_p12 }
 0x161   : > { %p891_p2 = por %p890_p7, %p889_p6 }
 0x162   : > { %p887_p13 = pneg %p886_p4 }
 0x163   : > { %p893_p1 = por %p892_p8, %p891_p2 }
 0x165   : > { %p894_p10 = pnand %p893_p1, %p887_p13 }
 0x167   : > { %897 = shalt.err (!%p894_p10)
}
 0x168   : > { %s964_s20 = smov 128   ;;  %s965_s22 = smov 8  }
 0x169   : > { %707 = dma.vmem_to_hbm [thread:$0]  (%p1339_p12), %s1264_s24, 2048, %s1262_s18, %s474_s26, %s964_s20, %s964_s20, %s965_s22  }
 0x16a PF: > { %s504_s15 = sand.u32 1, %s936_s12   ;;  %p1340_p3 = scmp.ne.s32.totalorder %s1332_s23, 0 }
 0x16b   : > { %p1341_p5 = scmp.ge.s32.totalorder %s956_s17, 2  ;;  %s505_s11 = scalar_lea.sflag [#allocation4], %s504_s15 }
 0x16d   : > { %p721_p9 = pnand %p1341_p5, %p1340_p3 }
 0x16f   : > { %931 = dma.done.wait (!%p721_p9), %s505_s11, 2048  }
 0x170   : > { %933 = vsyncadd (!%p721_p9), %s505_s11, 4294965248  ;;  %s20_s17 = sadd.s32 1, %s956_s17   ;;  %s1342_s12 = smov %s940_s13 }
 0x171   : > { %p17_p11 = scmp.ge.s32.totalorder %s20_s17, 4   ;;  %s1343_s13 = smov %s944_s14 }
 0x172   : > { %s1344_s14 = smov %s1132_s6  ;;  %s1345_s15 = smov %s952_s16 }
 0x173   : > { %s1346_s16 = smov %s1348_s25  ;;  %19 = sbr.rel (!%p17_p11) target bundleno = 7 (0x7), region = 85 }
 0x17a   :  { %510 = vsyncpa [#allocation3], 1 }
 0x17b   :  { %512 = vsyncpa [#allocation3 + $0x1], 1 }
 0x17c   :  { %513 = vsyncpa [#allocation6], 1 }
 0x17d   :  { %514 = vsyncpa [#allocation4], 1 }
 0x17e   :  { %516 = vsyncpa [#allocation4 + $0x1], 1 }

</bundles_post_ra>
